<compile_context>
chip_gen: v6e
topology: v6e:2x2x1
jax: 0.10.0
libtpu: 0.0.40
codegen_flags: <defaults>
</compile_context>

<pallas_src>
import jax
import jax.numpy as jnp
from jax.experimental import pallas as pl
from jax.experimental.pallas import tpu as pltpu

INPUT_DIM = 768
H1 = 256
H2 = 64
OUTPUT_DIM = 2
W3_PAD = 128  # final layer padded to 128 MXU lanes; sliced back to OUTPUT_DIM in-kernel


def _mlp_kernel(x_ref, w1_ref, b1_ref, w2_ref, b2_ref, w3_ref, b3_ref, o_ref):
    # x arrives f32; cast to bf16 on the VPU right before the first MXU dot.
    x = x_ref[...].astype(jnp.bfloat16)
    # linear_1: bf16 MXU dot, f32 accumulate; bias + ReLU in f32
    h = jnp.dot(x, w1_ref[...], preferred_element_type=jnp.float32)
    h = jnp.maximum(h + b1_ref[...], 0.0)
    # linear_2
    h = jnp.dot(h.astype(jnp.bfloat16), w2_ref[...], preferred_element_type=jnp.float32)
    h = jnp.maximum(h + b2_ref[...], 0.0)
    # linear_3: compute on the 128-lane-padded weights (pad columns are exactly zero),
    # then store only the real OUTPUT_DIM columns (narrow masked store).
    out = jnp.dot(h.astype(jnp.bfloat16), w3_ref[...], preferred_element_type=jnp.float32)
    out = out + b3_ref[...]
    o_ref[...] = out[:, :OUTPUT_DIM].astype(o_ref.dtype)


def prepare_params(params):
    """One-time weight prep (bf16 casts + lane padding). Call once, reuse every forward."""
    w1, b1, w2, b2, w3, b3 = params
    w1_bf16 = w1.astype(jnp.bfloat16)
    w2_bf16 = w2.astype(jnp.bfloat16)
    w3_pad = jnp.zeros((H2, W3_PAD), jnp.bfloat16).at[:, :OUTPUT_DIM].set(
        w3.astype(jnp.bfloat16))
    b3_pad = jnp.zeros((1, W3_PAD), jnp.float32).at[:, :OUTPUT_DIM].set(
        b3.astype(jnp.float32))
    return (w1_bf16,
            b1.reshape(1, H1).astype(jnp.float32),
            w2_bf16,
            b2.reshape(1, H2).astype(jnp.float32),
            w3_pad,
            b3_pad)


def _choose_tile(B, batch_tile):
    if B <= 8:
        # tiny batch: one grid step, minimal padding
        return 8
    if B <= 2 * batch_tile:
        # moderate batch: aim for 2 grid steps so both v7x TensorCores get work
        return ((pl.cdiv(B, 2) + 7) // 8) * 8
    # large batch: full-size tiles (multiple of 256 for the MXU)
    return batch_tile


def deep_nn_forward(x, prepared_params, *, batch_tile=2048):
    """Fused 3-layer MLP forward. x: (B, INPUT_DIM) f32 -> (B, OUTPUT_DIM) f32.

    prepared_params must come from prepare_params() (bf16 weights, padded final layer).
    """
    w1, b1, w2, b2, w3_pad, b3_pad = prepared_params
    B = x.shape[0]

    tile = _choose_tile(B, batch_tile)
    B_pad = pl.cdiv(B, tile) * tile
    if B_pad != B:
        x = jnp.pad(x, ((0, B_pad - B), (0, 0)))

    grid = (B_pad // tile,)
    # grid-invariant weights/biases: same block every step -> DMA'd once, VMEM-resident
    resident = lambda shape: pl.BlockSpec(shape, lambda i: (0, 0))

    flops = 2 * B_pad * (INPUT_DIM * H1 + H1 * H2 + H2 * W3_PAD)
    bytes_accessed = (
        B_pad * INPUT_DIM * 4                             # x (f32, cast in-kernel)
        + (INPUT_DIM * H1 + H1 * H2 + H2 * W3_PAD) * 2    # weights (bf16)
        + (H1 + H2 + W3_PAD) * 4                          # biases (f32)
        + B_pad * OUTPUT_DIM * 4                          # narrow output (f32)
    )

    out = pl.pallas_call(
        _mlp_kernel,
        out_shape=jax.ShapeDtypeStruct((B_pad, OUTPUT_DIM), jnp.float32),
        grid_spec=pltpu.PrefetchScalarGridSpec(
            num_scalar_prefetch=0,
            grid=grid,
            in_specs=[
                pl.BlockSpec((tile, INPUT_DIM), lambda i: (i, 0)),  # x tile (f32)
                resident((INPUT_DIM, H1)),   # w1 (bf16)
                resident((1, H1)),           # b1 (f32)
                resident((H1, H2)),          # w2 (bf16)
                resident((1, H2)),           # b2 (f32)
                resident((H2, W3_PAD)),      # w3 (bf16, lane-padded)
                resident((1, W3_PAD)),       # b3 (f32, lane-padded)
            ],
            out_specs=pl.BlockSpec((tile, OUTPUT_DIM), lambda i: (i, 0)),
        ),
        compiler_params=pltpu.CompilerParams(
            dimension_semantics=("parallel",),  # batch axis shards across TCs (v7x megacore)
        ),
        cost_estimate=pl.CostEstimate(
            flops=flops, transcendentals=0, bytes_accessed=bytes_accessed),
    )(x, w1, b1, w2, b2, w3_pad, b3_pad)

    return out[:B]


def init_params(key):
    """Deterministic parameter init mimicking nn.Linear (uniform +-1/sqrt(fan_in)).
    Weights kept as (in_features, out_features) — i.e. already transposed vs PyTorch."""
    ks = jax.random.split(key, 6)

    def linear(kw, kb, fan_in, fan_out):
        bound = 1.0 / jnp.sqrt(fan_in)
        w = jax.random.uniform(kw, (fan_in, fan_out), jnp.float32, -bound, bound)
        b = jax.random.uniform(kb, (1, fan_out), jnp.float32, -bound, bound)
        return w, b

    w1, b1 = linear(ks[0], ks[1], INPUT_DIM, H1)
    w2, b2 = linear(ks[2], ks[3], H1, H2)
    w3, b3 = linear(ks[4], ks[5], H2, OUTPUT_DIM)
    return (w1, b1, w2, b2, w3, b3)


def reference_forward_f32(x, params):
    """Original module semantics: full f32."""
    w1, b1, w2, b2, w3, b3 = params
    h = jnp.maximum(x @ w1 + b1, 0.0)
    h = jnp.maximum(h @ w2 + b2, 0.0)
    return h @ w3 + b3


def reference_forward_bf16(x, params):
    """Pure-JAX reference matching the kernel's dtype strategy (bf16 dots, f32 accumulation)."""
    w1, b1, w2, b2, w3, b3 = params
    bf = jnp.bfloat16
    h = jnp.dot(x.astype(bf), w1.astype(bf), preferred_element_type=jnp.float32) + b1
    h = jnp.maximum(h, 0.0)
    h = jnp.dot(h.astype(bf), w2.astype(bf), preferred_element_type=jnp.float32) + b2
    h = jnp.maximum(h, 0.0)
    return jnp.dot(h.astype(bf), w3.astype(bf), preferred_element_type=jnp.float32) + b3


if __name__ == "__main__":
    key = jax.random.PRNGKey(0)
    k_x, k_p = jax.random.split(key)

    batch = 8  # small demo batch; feature dims come from the module (768 -> 256 -> 64 -> 2)
    x = jax.random.normal(k_x, (batch, INPUT_DIM), dtype=jnp.float32)
    params = init_params(k_p)
    prepared = jax.block_until_ready(prepare_params(params))  # one-time weight prep

    out = deep_nn_forward(x, prepared)
    out = jax.block_until_ready(out)
    assert out.shape == (batch, OUTPUT_DIM)

    ref_bf16 = reference_forward_bf16(x, params)
    ref_f32 = reference_forward_f32(x, params)
    assert jnp.allclose(out, ref_bf16, atol=2e-3, rtol=2e-3), "mismatch vs bf16-faithful reference"
    assert jnp.allclose(out, ref_f32, atol=5e-2, rtol=5e-2), "mismatch vs f32 reference"

    print("KERNEL_OK")
</pallas_src>

<mosaic_0001>
module attributes {stable_mosaic.version = 11 : i64} {
  func.func @_mlp_kernel(%arg0: i32, %arg1: memref<8x768xf32, #tpu.memory_space<vmem>>, %arg2: memref<768x256xbf16, #tpu.memory_space<vmem>>, %arg3: memref<1x256xf32, #tpu.memory_space<vmem>>, %arg4: memref<256x64xbf16, #tpu.memory_space<vmem>>, %arg5: memref<1x64xf32, #tpu.memory_space<vmem>>, %arg6: memref<64x128xbf16, #tpu.memory_space<vmem>>, %arg7: memref<1x128xf32, #tpu.memory_space<vmem>>, %arg8: memref<8x2xf32, #tpu.memory_space<vmem>>) attributes {dimension_semantics = [#tpu.dimension_semantics<parallel>], iteration_bounds = array<i64: 1>, scalar_prefetch = 0 : i64, scratch_operands = 0 : i64, tpu.core_type = #tpu.core_type<tc>, window_params = [{transform_indices = @transform_0, window_bounds = array<i64: 8, 768>}, {pipeline_mode = #tpu.pipeline_mode<synchronous>, transform_indices = @transform_1, window_bounds = array<i64: 768, 256>}, {pipeline_mode = #tpu.pipeline_mode<synchronous>, transform_indices = @transform_2, window_bounds = array<i64: 1, 256>}, {pipeline_mode = #tpu.pipeline_mode<synchronous>, transform_indices = @transform_3, window_bounds = array<i64: 256, 64>}, {pipeline_mode = #tpu.pipeline_mode<synchronous>, transform_indices = @transform_4, window_bounds = array<i64: 1, 64>}, {pipeline_mode = #tpu.pipeline_mode<synchronous>, transform_indices = @transform_5, window_bounds = array<i64: 64, 128>}, {pipeline_mode = #tpu.pipeline_mode<synchronous>, transform_indices = @transform_6, window_bounds = array<i64: 1, 128>}, {transform_indices = @transform_7, window_bounds = array<i64: 8, 2>}]} {
    %c0 = arith.constant 0 : index
    %c0_0 = arith.constant 0 : index
    %0 = vector.load %arg1[%c0, %c0_0] : memref<8x768xf32, #tpu.memory_space<vmem>>, vector<8x768xf32>
    %1 = arith.truncf %0 : vector<8x768xf32> to vector<8x768xbf16>
    %c0_1 = arith.constant 0 : index
    %c0_2 = arith.constant 0 : index
    %2 = vector.load %arg2[%c0_1, %c0_2] : memref<768x256xbf16, #tpu.memory_space<vmem>>, vector<768x256xbf16>
    %cst = arith.constant dense<0.000000e+00> : vector<8x256xf32>
    %3 = tpu.matmul %1, %2, %cst {dimension_numbers = #tpu.dot_dimension_numbers<[1], [0], [0], [1], [0, 0, 1, 1], [], []>} : vector<8x768xbf16>, vector<768x256xbf16>, vector<8x256xf32> -> vector<8x256xf32>
    %c0_3 = arith.constant 0 : index
    %c0_4 = arith.constant 0 : index
    %4 = vector.load %arg3[%c0_3, %c0_4] : memref<1x256xf32, #tpu.memory_space<vmem>>, vector<1x256xf32>
    %5 = vector.broadcast %4 : vector<1x256xf32> to vector<8x256xf32>
    %6 = arith.addf %3, %5 : vector<8x256xf32>
    %cst_5 = arith.constant 0.000000e+00 : f32
    %7 = vector.broadcast %cst_5 : f32 to vector<8x256xf32>
    %8 = arith.maximumf %6, %7 : vector<8x256xf32>
    %9 = arith.truncf %8 : vector<8x256xf32> to vector<8x256xbf16>
    %c0_6 = arith.constant 0 : index
    %c0_7 = arith.constant 0 : index
    %10 = vector.load %arg4[%c0_6, %c0_7] : memref<256x64xbf16, #tpu.memory_space<vmem>>, vector<256x64xbf16>
    %cst_8 = arith.constant dense<0.000000e+00> : vector<8x64xf32>
    %11 = tpu.matmul %9, %10, %cst_8 {dimension_numbers = #tpu.dot_dimension_numbers<[1], [0], [0], [1], [0, 0, 1, 1], [], []>} : vector<8x256xbf16>, vector<256x64xbf16>, vector<8x64xf32> -> vector<8x64xf32>
    %c0_9 = arith.constant 0 : index
    %c0_10 = arith.constant 0 : index
    %12 = vector.load %arg5[%c0_9, %c0_10] : memref<1x64xf32, #tpu.memory_space<vmem>>, vector<1x64xf32>
    %13 = vector.broadcast %12 : vector<1x64xf32> to vector<8x64xf32>
    %14 = arith.addf %11, %13 : vector<8x64xf32>
    %cst_11 = arith.constant 0.000000e+00 : f32
    %15 = vector.broadcast %cst_11 : f32 to vector<8x64xf32>
    %16 = arith.maximumf %14, %15 : vector<8x64xf32>
    %17 = arith.truncf %16 : vector<8x64xf32> to vector<8x64xbf16>
    %c0_12 = arith.constant 0 : index
    %c0_13 = arith.constant 0 : index
    %18 = vector.load %arg6[%c0_12, %c0_13] : memref<64x128xbf16, #tpu.memory_space<vmem>>, vector<64x128xbf16>
    %cst_14 = arith.constant dense<0.000000e+00> : vector<8x128xf32>
    %19 = tpu.matmul %17, %18, %cst_14 {dimension_numbers = #tpu.dot_dimension_numbers<[1], [0], [0], [1], [0, 0, 1, 1], [], []>} : vector<8x64xbf16>, vector<64x128xbf16>, vector<8x128xf32> -> vector<8x128xf32>
    %c0_15 = arith.constant 0 : index
    %c0_16 = arith.constant 0 : index
    %20 = vector.load %arg7[%c0_15, %c0_16] : memref<1x128xf32, #tpu.memory_space<vmem>>, vector<1x128xf32>
    %21 = vector.broadcast %20 : vector<1x128xf32> to vector<8x128xf32>
    %22 = arith.addf %19, %21 : vector<8x128xf32>
    %23 = vector.extract_strided_slice %22 {offsets = [0, 0], sizes = [8, 2], strides = [1, 1]} : vector<8x128xf32> to vector<8x2xf32>
    %c0_17 = arith.constant 0 : index
    %c0_18 = arith.constant 0 : index
    %24 = vector.load %arg8[%c0_17, %c0_18] : memref<8x2xf32, #tpu.memory_space<vmem>>, vector<8x2xf32>
    tpu.vector_store %arg8[%c0_17, %c0_18], %23 {strides = array<i32>} : memref<8x2xf32, #tpu.memory_space<vmem>>, vector<8x2xf32>,
    return
  }
  func.func @transform_0(%arg0: i32) -> (i32, i32) {
    %c0_i32 = arith.constant 0 : i32
    %c0_i32_0 = arith.constant 0 : i32
    return %arg0, %c0_i32 : i32, i32
  }
  func.func @transform_1(%arg0: i32) -> (i32, i32) {
    %c0_i32 = arith.constant 0 : i32
    %c0_i32_0 = arith.constant 0 : i32
    %c0_i32_1 = arith.constant 0 : i32
    return %c0_i32, %c0_i32_0 : i32, i32
  }
  func.func @transform_2(%arg0: i32) -> (i32, i32) {
    %c0_i32 = arith.constant 0 : i32
    %c0_i32_0 = arith.constant 0 : i32
    %c0_i32_1 = arith.constant 0 : i32
    return %c0_i32, %c0_i32_0 : i32, i32
  }
  func.func @transform_3(%arg0: i32) -> (i32, i32) {
    %c0_i32 = arith.constant 0 : i32
    %c0_i32_0 = arith.constant 0 : i32
    %c0_i32_1 = arith.constant 0 : i32
    return %c0_i32, %c0_i32_0 : i32, i32
  }
  func.func @transform_4(%arg0: i32) -> (i32, i32) {
    %c0_i32 = arith.constant 0 : i32
    %c0_i32_0 = arith.constant 0 : i32
    %c0_i32_1 = arith.constant 0 : i32
    return %c0_i32, %c0_i32_0 : i32, i32
  }
  func.func @transform_5(%arg0: i32) -> (i32, i32) {
    %c0_i32 = arith.constant 0 : i32
    %c0_i32_0 = arith.constant 0 : i32
    %c0_i32_1 = arith.constant 0 : i32
    return %c0_i32, %c0_i32_0 : i32, i32
  }
  func.func @transform_6(%arg0: i32) -> (i32, i32) {
    %c0_i32 = arith.constant 0 : i32
    %c0_i32_0 = arith.constant 0 : i32
    %c0_i32_1 = arith.constant 0 : i32
    return %c0_i32, %c0_i32_0 : i32, i32
  }
  func.func @transform_7(%arg0: i32) -> (i32, i32) {
    %c0_i32 = arith.constant 0 : i32
    %c0_i32_0 = arith.constant 0 : i32
    return %arg0, %c0_i32 : i32, i32
  }
}

</mosaic_0001>

<bundles_post_ra>
// kernel: tpu_custom_call.1
= control target key start
LH: loop header
LB: loop body
LE: loop exit
PB: predicated region body
PF: predicated region fallthrough
CT: control target
= control target key end

     0   :  { %12 = vsyncpa [#allocation3], 0  ;;  %s1384_s24 = smov [#allocation2]   ;;  %s1522_s0 = inlined_call_operand.vmem [shape: f32[8,768], index: 0, kind: input, shape index: {}]   ;;  %s1523_s1 = inlined_call_operand.hbm [shape: bf16[768,256], index: 1, kind: input, shape index: {}]   ;;  %s1524_s2 = inlined_call_operand.vmem [shape: f32[1,256], index: 2, kind: input, shape index: {}]   ;;  %s1525_s3 = inlined_call_operand.vmem [shape: bf16[256,64], index: 3, kind: input, shape index: {}]   ;;  %s1526_s4 = inlined_call_operand.vmem [shape: f32[1,64], index: 4, kind: input, shape index: {}]   ;;  %s1527_s5 = inlined_call_operand.vmem [shape: bf16[64,128], index: 5, kind: input, shape index: {}]   ;;  %s1528_s6 = inlined_call_operand.vmem [shape: f32[1,128], index: 6, kind: input, shape index: {}]   ;;  %s1529_s7 = inlined_call_operand.vmem [shape: f32[8,2], index: 7, kind: output, shape index: {}]  }
   0x1   :  { %s20_s25 = sshll.u32 %s1384_s24, 4  ;;  %s21_s25 = int_to_ptr.vmem [resolvable:$true] %s20_s25 }
   0x2   :  { %s1370_s26 = scalar_lea.vmem %s21_s25, 12288  ;;  %p1375_p1 = scmp.lt.s32.totalorder %s21_s25, %s21_s25 }
   0x3   :  { %p1371_p0 = scmp.ne.s32.totalorder %s21_s25, %s1370_s26  ;;  %p1376_p2 = scmp.lt.s32.totalorder %s1370_s26, %s1370_s26 }
   0x5   :  { %p1377_p3 = por %p1376_p2, %p1375_p1 }
   0x7   :  { %p1378_p4 = pnand %p1377_p3, %p1371_p0 }
   0x9   :  { %1381 = shalt.err (!%p1378_p4)
}
   0xa   :  { %s1385_s27 = smov 128   ;;  %s1386_s28 = smov 8  }
   0xb   :  { %26 = dma.hbm_to_vmem [thread:$0]  %s1523_s1, 12288, %s21_s25, [#allocation3], %s1385_s27, %s1385_s27, %s1386_s28  }
   0xc   :  { %1382 = dma.done.wait [#allocation3], 12288  }
   0xd   :  { %1383 = vsyncadd [#allocation3], 4294955008  ;;  %v1198_v0 = vld [vmem:[#allocation2 + $0x74] ss:$8 sps:$4 sm:$0xff]   ;;  %v1200_v1 = vld [vmem:[#allocation2 + $0x70] ss:$8 sps:$4 sm:$0xff]  }
   0xe   :  { %641 = vmatprep.subr.bf16.mxu0 %v1198_v0  ;;  %v1201_v2 = vld [vmem:[#allocation2 + $0x174] ss:$8 sps:$4 sm:$0xff]   ;;  %v1203_v3 = vld [vmem:[#allocation2 + $0x170] ss:$8 sps:$4 sm:$0xff]   ;;  %v1204_v4 = vld [vmem:[#allocation2 + $0x64] ss:$8 sps:$4 sm:$0xff]  }
   0xf   :  { %642 = vmatpush1.bf16.msra.mxu0 %v1200_v1  ;;  %v1206_v5 = vld [vmem:[#allocation2 + $0x60] ss:$8 sps:$4 sm:$0xff]   ;;  %682 = vmatprep.subr.bf16.mxu1 %v1201_v2  ;;  %v1207_v6 = vld [vmem:[#allocation2 + $0x164] ss:$8 sps:$4 sm:$0xff]   ;;  %v1210_v8 = vld [vmem:[#allocation2 + $0x54] ss:$8 sps:$4 sm:$0xff]  }
  0x10   :  { %683 = vmatpush1.bf16.msra.mxu1 %v1203_v3  ;;  %643 = vmatprep.subr.bf16.mxu0 %v1204_v4  ;;  %v1209_v7 = vld [vmem:[#allocation2 + $0x160] ss:$8 sps:$4 sm:$0xff]   ;;  %v1212_v9 = vld [vmem:[#allocation2 + $0x50] ss:$8 sps:$4 sm:$0xff]   ;;  %v1213_v10 = vld [vmem:[#allocation2 + $0x154] ss:$8 sps:$4 sm:$0xff]  }
  0x11   :  { %684 = vmatprep.subr.bf16.mxu1 %v1207_v6  ;;  %v1216_v11 = vld [vmem:[#allocation2 + $0x44] ss:$8 sps:$4 sm:$0xff]   ;;  %v1215_v12 = vld [vmem:[#allocation2 + $0x150] ss:$8 sps:$4 sm:$0xff]   ;;  %v1218_v14 = vld [vmem:[#allocation2 + $0x40] ss:$8 sps:$4 sm:$0xff]  }
  0x12   :  { %v1219_v13 = vld [vmem:[#allocation2 + $0x144] ss:$8 sps:$4 sm:$0xff]   ;;  %v1222_v15 = vld [vmem:[#allocation2 + $0x34] ss:$8 sps:$4 sm:$0xff]   ;;  %v1221_v16 = vld [vmem:[#allocation2 + $0x140] ss:$8 sps:$4 sm:$0xff]  }
  0x13   :  { %644 = vmatpush1.bf16.msra.mxu0 %v1206_v5  ;;  %v1225_v17 = vld [vmem:[#allocation2 + $0x134] ss:$8 sps:$4 sm:$0xff]   ;;  %v1224_v18 = vld [vmem:[#allocation2 + $0x30] ss:$8 sps:$4 sm:$0xff]   ;;  %v1228_v19 = vld [vmem:[#allocation2 + $0x24] ss:$8 sps:$4 sm:$0xff]  }
  0x14   :  { %645 = vmatprep.subr.bf16.mxu0 %v1210_v8  ;;  %685 = vmatpush1.bf16.msra.mxu1 %v1209_v7  ;;  %v1227_v20 = vld [vmem:[#allocation2 + $0x130] ss:$8 sps:$4 sm:$0xff]   ;;  %v1231_v21 = vld [vmem:[#allocation2 + $0x124] ss:$8 sps:$4 sm:$0xff]   ;;  %v1230_v22 = vld [vmem:[#allocation2 + $0x20] ss:$8 sps:$4 sm:$0xff]  }
  0x15   :  { %686 = vmatprep.subr.bf16.mxu1 %v1213_v10  ;;  %v1234_v23 = vld [vmem:[#allocation2 + $0x14] ss:$8 sps:$4 sm:$0xff]   ;;  %v1233_v24 = vld [vmem:[#allocation2 + $0x120] ss:$8 sps:$4 sm:$0xff]   ;;  %v1236_v26 = vld [vmem:[#allocation2 + $0x10] ss:$8 sps:$4 sm:$0xff]  }
  0x16   :  { %v1237_v25 = vld [vmem:[#allocation2 + $0x114] ss:$8 sps:$4 sm:$0xff]   ;;  %v1240_v27 = vld [vmem:[#allocation2 + $0x4] ss:$8 sps:$4 sm:$0xff]   ;;  %v1239_v28 = vld [vmem:[#allocation2 + $0x110] ss:$8 sps:$4 sm:$0xff]  }
  0x17   :  { %646 = vmatpush1.bf16.msra.mxu0 %v1212_v9  ;;  %v1243_v29 = vld [vmem:[#allocation2 + $0x104] ss:$8 sps:$4 sm:$0xff]   ;;  %v1242_v30 = vld [vmem:[#allocation2] ss:$8 sps:$4 sm:$0xff]   ;;  %v1246_v31 = vld [vmem:[#allocation2 + $0xf4] ss:$8 sps:$4 sm:$0xff]  }
  0x18   :  { %647 = vmatprep.subr.bf16.mxu0 %v1216_v11  ;;  %687 = vmatpush1.bf16.msra.mxu1 %v1215_v12  ;;  %v1245_v32 = vld [vmem:[#allocation2 + $0x100] ss:$8 sps:$4 sm:$0xff]   ;;  %v1249_v33 = vld [vmem:[#allocation2 + $0x1f4] ss:$8 sps:$4 sm:$0xff]   ;;  %v1248_v34 = vld [vmem:[#allocation2 + $0xf0] ss:$8 sps:$4 sm:$0xff]  }
  0x19   :  { %688 = vmatprep.subr.bf16.mxu1 %v1219_v13  ;;  %v1252_v35 = vld [vmem:[#allocation2 + $0xe4] ss:$8 sps:$4 sm:$0xff]   ;;  %v1251_v36 = vld [vmem:[#allocation2 + $0x1f0] ss:$8 sps:$4 sm:$0xff]   ;;  %v1254_v38 = vld [vmem:[#allocation2 + $0xe0] ss:$8 sps:$4 sm:$0xff]  }
  0x1a   :  { %v1255_v37 = vld [vmem:[#allocation2 + $0x1e4] ss:$8 sps:$4 sm:$0xff]   ;;  %v1258_v39 = vld [vmem:[#allocation2 + $0xd4] ss:$8 sps:$4 sm:$0xff]   ;;  %v1257_v40 = vld [vmem:[#allocation2 + $0x1e0] ss:$8 sps:$4 sm:$0xff]  }
  0x1b   :  { %648 = vmatpush1.bf16.msra.mxu0 %v1218_v14  ;;  %v1261_v41 = vld [vmem:[#allocation2 + $0x1d4] ss:$8 sps:$4 sm:$0xff]   ;;  %v1260_v42 = vld [vmem:[#allocation2 + $0xd0] ss:$8 sps:$4 sm:$0xff]   ;;  %v1264_v43 = vld [vmem:[#allocation2 + $0xc4] ss:$8 sps:$4 sm:$0xff]  }
  0x1c   :  { %649 = vmatprep.subr.bf16.mxu0 %v1222_v15  ;;  %689 = vmatpush1.bf16.msra.mxu1 %v1221_v16  ;;  %v1263_v44 = vld [vmem:[#allocation2 + $0x1d0] ss:$8 sps:$4 sm:$0xff]   ;;  %v1267_v45 = vld [vmem:[#allocation2 + $0x1c4] ss:$8 sps:$4 sm:$0xff]   ;;  %v1266_v47 = vld [vmem:[#allocation2 + $0xc0] ss:$8 sps:$4 sm:$0xff]  }
  0x1d   :  { %690 = vmatprep.subr.bf16.mxu1 %v1225_v17  ;;  %v42_v46 = vld [vmem:[%s1522_s0 + $0x8] sm:$0xff]  ;;  %v1270_v49 = vld [vmem:[#allocation2 + $0xb4] ss:$8 sps:$4 sm:$0xff]   ;;  %v1272_v54 = vld [vmem:[#allocation2 + $0xb0] ss:$8 sps:$4 sm:$0xff]   ;;  %vm1388_vm0 = vmmov 0  }
  0x1e   :  { %v48_v48 = vpack.c.bf16 %v42_v46, %v42_v46  ;;  %v44_v50 = vld [vmem:[%s1522_s0 + $0x18] sm:$0xff]  ;;  %v1269_v51 = vld [vmem:[#allocation2 + $0x1c0] ss:$8 sps:$4 sm:$0xff]   ;;  %v1276_v55 = vld [vmem:[#allocation2 + $0xa4] ss:$8 sps:$4 sm:$0xff]   ;;  %vm984_vm1 = vcmask 523264  }
  0x1f   :  { %650 = vmatpush1.bf16.msra.mxu0 %v1224_v18  ;;  %v50_v52 = vpack.c.bf16 %v44_v50, %v44_v50  ;;  %v1273_v53 = vld [vmem:[#allocation2 + $0x1b4] ss:$8 sps:$4 sm:$0xff]   ;;  %v1275_v56 = vld [vmem:[#allocation2 + $0x1b0] ss:$8 sps:$4 sm:$0xff]   ;;  %v1279_v57 = vld [vmem:[#allocation2 + $0x1a4] ss:$8 sps:$4 sm:$0xff]  }
  0x20   :  { %651 = vmatprep.subr.bf16.mxu0 %v1228_v19  ;;  %691 = vmatpush1.bf16.msra.mxu1 %v1227_v20  ;;  %v1278_v58 = vld [vmem:[#allocation2 + $0xa0] ss:$8 sps:$4 sm:$0xff]   ;;  %v1282_v59 = vld [vmem:[#allocation2 + $0x94] ss:$8 sps:$4 sm:$0xff]   ;;  %v1284_v62 = vld [vmem:[#allocation2 + $0x90] ss:$8 sps:$4 sm:$0xff]  }
  0x21   :  { %692 = vmatprep.subr.bf16.mxu1 %v1231_v21  ;;  %673 = vmatprep.mubr.bf16.mxu0 %v48_v48  ;;  %v1281_v60 = vld [vmem:[#allocation2 + $0x1a0] ss:$8 sps:$4 sm:$0xff]   ;;  %v1285_v61 = vld [vmem:[#allocation2 + $0x194] ss:$8 sps:$4 sm:$0xff]   ;;  %v1288_v63 = vld [vmem:[#allocation2 + $0x84] ss:$8 sps:$4 sm:$0xff]  }
  0x22   :  { %714 = vmatprep.mubr.bf16.mxu1 %v50_v52  ;;  %v1287_v0 = vld [vmem:[#allocation2 + $0x190] ss:$8 sps:$4 sm:$0xff]   ;;  %v1290_v1 = vld [vmem:[#allocation2 + $0x80] ss:$8 sps:$4 sm:$0xff]   ;;  %v1291_v2 = vld [vmem:[#allocation2 + $0x184] ss:$8 sps:$4 sm:$0xff]  }
  0x23   :  { %652 = vmatpush1.bf16.msra.mxu0 %v1230_v22  ;;  %v1293_v3 = vld [vmem:[#allocation2 + $0x180] ss:$8 sps:$4 sm:$0xff]   ;;  %v1296_v5 = vld [vmem:[#allocation2 + $0x274] ss:$8 sps:$4 sm:$0xff]   ;;  %v1294_v8 = vld [vmem:[#allocation2 + $0x270] ss:$8 sps:$4 sm:$0xff]  }
  0x24   :  { %653 = vmatprep.subr.bf16.mxu0 %v1234_v23  ;;  %693 = vmatpush1.bf16.msra.mxu1 %v1233_v24  ;;  %v41_v4 = vld [vmem:[%s1522_s0] sm:$0xff]  ;;  %v43_v6 = vld [vmem:[%s1522_s0 + $0x10] sm:$0xff]  ;;  %v46_v12 = vld [vmem:[%s1522_s0 + $0x28] sm:$0xff]  ;;  %vm1028_vm2 = vcmask 15360  }
  0x25   :  { %694 = vmatprep.subr.bf16.mxu1 %v1237_v25  ;;  %v47_v7 = vpack.c.bf16 %v41_v4, %v41_v4  ;;  %v49_v9 = vpack.c.bf16 %v43_v6, %v43_v6  ;;  %v1299_v10 = vld [vmem:[#allocation2 + $0x264] ss:$8 sps:$4 sm:$0xff]   ;;  %v1297_v11 = vld [vmem:[#allocation2 + $0x260] ss:$8 sps:$4 sm:$0xff]   ;;  %v1302_v13 = vld [vmem:[#allocation2 + $0x254] ss:$8 sps:$4 sm:$0xff]   ;;  %v52_v14 = vpack.c.bf16 %v46_v12, %v46_v12 }
  0x26   :  { %v1300_v15 = vld [vmem:[#allocation2 + $0x250] ss:$8 sps:$4 sm:$0xff]   ;;  %v1305_v16 = vld [vmem:[#allocation2 + $0x244] ss:$8 sps:$4 sm:$0xff]   ;;  %v1303_v17 = vld [vmem:[#allocation2 + $0x240] ss:$8 sps:$4 sm:$0xff]  }
  0x27   :  { %654 = vmatpush1.bf16.msra.mxu0 %v1236_v26  ;;  %v1308_v18 = vld [vmem:[#allocation2 + $0x234] ss:$8 sps:$4 sm:$0xff]   ;;  %v1306_v19 = vld [vmem:[#allocation2 + $0x230] ss:$8 sps:$4 sm:$0xff]   ;;  %v1311_v20 = vld [vmem:[#allocation2 + $0x224] ss:$8 sps:$4 sm:$0xff]  }
  0x28   :  { %655 = vmatprep.subr.bf16.mxu0 %v1240_v27  ;;  %695 = vmatpush1.bf16.msra.mxu1 %v1239_v28  ;;  %v1309_v21 = vld [vmem:[#allocation2 + $0x220] ss:$8 sps:$4 sm:$0xff]   ;;  %v1314_v22 = vld [vmem:[#allocation2 + $0x214] ss:$8 sps:$4 sm:$0xff]   ;;  %v1312_v23 = vld [vmem:[#allocation2 + $0x210] ss:$8 sps:$4 sm:$0xff]  }
  0x29   :  { %696 = vmatprep.subr.bf16.mxu1 %v1243_v29  ;;  %v1317_v24 = vld [vmem:[#allocation2 + $0x204] ss:$8 sps:$4 sm:$0xff]   ;;  %v1315_v25 = vld [vmem:[#allocation2 + $0x200] ss:$8 sps:$4 sm:$0xff]   ;;  %v1320_v26 = vld [vmem:[#allocation2 + $0x2f4] ss:$8 sps:$4 sm:$0xff]  }
  0x2a   :  { %v1318_v27 = vld [vmem:[#allocation2 + $0x2f0] ss:$8 sps:$4 sm:$0xff]   ;;  %v1323_v28 = vld [vmem:[#allocation2 + $0x2e4] ss:$8 sps:$4 sm:$0xff]   ;;  %v1321_v29 = vld [vmem:[#allocation2 + $0x2e0] ss:$8 sps:$4 sm:$0xff]  }
  0x2b   :  { %656 = vmatpush1.bf16.msra.mxu0 %v1242_v30  ;;  %v1326_v30 = vld [vmem:[#allocation2 + $0x2d4] ss:$8 sps:$4 sm:$0xff]   ;;  %v1346_v48 = vld [vmem:[%s1525_s3 + $0x68] sm:$0xff]   ;;  %v1348_v50 = vld [vmem:[%s1525_s3 + $0x60] sm:$0xff]  }
  0x2c   :  { %657 = vmatprep.subr.bf16.mxu0 %v1246_v31  ;;  %697 = vmatpush1.bf16.msra.mxu1 %v1245_v32  ;;  %v1324_v31 = vld [vmem:[#allocation2 + $0x2d0] ss:$8 sps:$4 sm:$0xff]   ;;  %v1329_v32 = vld [vmem:[#allocation2 + $0x2c4] ss:$8 sps:$4 sm:$0xff]  }
  0x2d   :  { %698 = vmatprep.subr.bf16.mxu1 %v1249_v33  ;;  %v1327_v33 = vld [vmem:[#allocation2 + $0x2c0] ss:$8 sps:$4 sm:$0xff]   ;;  %v1344_v46 = vld [vmem:[%s1525_s3 + $0x70] sm:$0xff]   ;;  %v1350_v52 = vld [vmem:[%s1525_s3 + $0x58] sm:$0xff]  }
  0x2f   :  { %658 = vmatpush2.bf16.msra.mxu0 %v1248_v34  ;;  %v1332_v34 = vld [vmem:[#allocation2 + $0x2b4] ss:$8 sps:$4 sm:$0xff]  }
  0x30   :  { %659 = vmatprep.subr.bf16.mxu0 %v1252_v35  ;;  %699 = vmatpush2.bf16.msra.mxu1 %v1251_v36  ;;  %v1330_v35 = vld [vmem:[#allocation2 + $0x2b0] ss:$8 sps:$4 sm:$0xff]   ;;  %v1335_v36 = vld [vmem:[#allocation2 + $0x2a4] ss:$8 sps:$4 sm:$0xff]  }
  0x31   :  { %700 = vmatprep.subr.bf16.mxu1 %v1255_v37  ;;  %v1333_v37 = vld [vmem:[#allocation2 + $0x2a0] ss:$8 sps:$4 sm:$0xff]  }
  0x33   :  { %660 = vmatpush2.bf16.msra.mxu0 %v1254_v38  ;;  %v1338_v38 = vld [vmem:[#allocation2 + $0x294] ss:$8 sps:$4 sm:$0xff]  }
  0x34   :  { %661 = vmatprep.subr.bf16.mxu0 %v1258_v39  ;;  %701 = vmatpush2.bf16.msra.mxu1 %v1257_v40  ;;  %v1336_v39 = vld [vmem:[#allocation2 + $0x290] ss:$8 sps:$4 sm:$0xff]   ;;  %v1341_v40 = vld [vmem:[#allocation2 + $0x284] ss:$8 sps:$4 sm:$0xff]  }
  0x35   :  { %702 = vmatprep.subr.bf16.mxu1 %v1261_v41  ;;  %v1339_v41 = vld [vmem:[#allocation2 + $0x280] ss:$8 sps:$4 sm:$0xff]  }
  0x37   :  { %662 = vmatpush2.bf16.msra.mxu0 %v1260_v42  ;;  %v45_v42 = vld [vmem:[%s1522_s0 + $0x20] sm:$0xff] }
  0x38   :  { %663 = vmatprep.subr.bf16.mxu0 %v1264_v43  ;;  %703 = vmatpush2.bf16.msra.mxu1 %v1263_v44  ;;  %v51_v43 = vpack.c.bf16 %v45_v42, %v45_v42  ;;  %v1342_v44 = vld [vmem:[%s1525_s3 + $0x78] sm:$0xff]  }
  0x39   :  { %704 = vmatprep.subr.bf16.mxu1 %v1267_v45  ;;  %v1343_v45 = vld [vmem:[%s1525_s3 + $0x38] sm:$0xff]  }
  0x3b   :  { %664 = vmatpush2.bf16.msra.mxu0 %v1266_v47  ;;  %v1345_v47 = vld [vmem:[%s1525_s3 + $0x30] sm:$0xff]  }
  0x3c   :  { %665 = vmatprep.subr.bf16.mxu0 %v1270_v49  ;;  %705 = vmatpush2.bf16.msra.mxu1 %v1269_v51  ;;  %v1347_v49 = vld [vmem:[%s1525_s3 + $0x28] sm:$0xff]   ;;  %v1349_v51 = vld [vmem:[%s1525_s3 + $0x20] sm:$0xff]  }
  0x3d   :  { %706 = vmatprep.subr.bf16.mxu1 %v1273_v53  ;;  %v1351_v53 = vld [vmem:[%s1525_s3 + $0x18] sm:$0xff]  }
  0x3f   :  { %666 = vmatpush2.bf16.msra.mxu0 %v1272_v54  ;;  %v1352_v54 = vld [vmem:[%s1525_s3 + $0x50] sm:$0xff]  }
  0x40   :  { %667 = vmatprep.subr.bf16.mxu0 %v1276_v55  ;;  %707 = vmatpush2.bf16.msra.mxu1 %v1275_v56  ;;  %v1353_v55 = vld [vmem:[%s1525_s3 + $0x10] sm:$0xff]   ;;  %v1354_v56 = vld [vmem:[%s1525_s3 + $0x48] sm:$0xff]  }
  0x41   :  { %708 = vmatprep.subr.bf16.mxu1 %v1279_v57  ;;  %v1355_v57 = vld [vmem:[%s1525_s3 + $0x8] sm:$0xff]  }
  0x43   :  { %668 = vmatpush2.bf16.msra.mxu0 %v1278_v58  ;;  %v1356_v58 = vld [vmem:[%s1525_s3 + $0x40] sm:$0xff]  }
  0x44   :  { %669 = vmatprep.subr.bf16.mxu0 %v1282_v59  ;;  %709 = vmatpush2.bf16.msra.mxu1 %v1281_v60  ;;  %v1357_v59 = vld [vmem:[%s1525_s3] sm:$0xff]   ;;  %v1387_v60 = vmov 0.0  }
  0x45   :  { %710 = vmatprep.subr.bf16.mxu1 %v1285_v61 }
  0x47   :  { %670 = vmatpush2.bf16.msra.mxu0 %v1284_v62 }
  0x48   :  { %671 = vmatprep.subr.bf16.mxu0 %v1288_v63  ;;  %711 = vmatpush2.bf16.msra.mxu1 %v1287_v0 }
  0x49   :  { %712 = vmatprep.subr.bf16.mxu1 %v1291_v2 }
  0x4b   :  { %672 = vmatpush2.bf16.msra.mxu0 %v1290_v1 }
  0x4c   :  { %723 = vmatprep.subr.bf16.mxu0 %v1296_v5  ;;  %713 = vmatpush2.bf16.msra.mxu1 %v1293_v3  ;;  %v151_v5 = vlaneseq }
  0x4d   :  { %1154 = vmatprep.subr.bf16.mxu1 %v1342_v44 }
  0x4e   :  { %674 = vmatmul.mubr.bf16.vlgmr.msra.gmra.mxu0 %v47_v7  ;;  %v152_v6 = vshrl.u32 %v151_v5, 7 }
  0x4f   :  { %724 = vmatpush1.bf16.msra.mxu0 %v1294_v8  ;;  %715 = vmatmul.mubr.bf16.vlgmr.msra.gmra.mxu1 %v49_v9  ;;  %v149_v8 = vld [vmem:[%s1524_s2] sm:$0x3] }
  0x50   :  { %725 = vmatprep.subr.bf16.mxu0 %v1299_v10  ;;  %755 = vmatprep.mubr.bf16.mxu0 %v52_v14  ;;  %v153_v7 = vsub.s32 0, %v152_v6  ;;  %v157_v9 = vsub.s32 1, %v152_v6 }
  0x51   :  { %1155 = vmatpush3.bf16.msra.mxu1 %v1343_v45 }
  0x52   :  { %1156 = vmatprep.subr.bf16.mxu1 %v1344_v46  ;;  %v154_v10 = vrot.slane %v149_v8, %v153_v7 }
  0x53   :  { %726 = vmatpush1.bf16.msra.mxu0 %v1297_v11  ;;  %v158_v11 = vrot.slane %v149_v8, %v157_v9 }
  0x54   :  { %727 = vmatprep.subr.bf16.mxu0 %v1302_v13 }
  0x55   :  { %1157 = vmatpush3.bf16.msra.mxu1 %v1345_v47 }
  0x56   :  { %1158 = vmatprep.subr.bf16.mxu1 %v1346_v48 }
  0x57   :  { %728 = vmatpush1.bf16.msra.mxu0 %v1300_v15 }
  0x58   :  { %729 = vmatprep.subr.bf16.mxu0 %v1305_v16 }
  0x59   :  { %1159 = vmatpush3.bf16.msra.mxu1 %v1347_v49 }
  0x5a   :  { %1160 = vmatprep.subr.bf16.mxu1 %v1348_v50 }
  0x5b   :  { %730 = vmatpush1.bf16.msra.mxu0 %v1303_v17 }
  0x5c   :  { %731 = vmatprep.subr.bf16.mxu0 %v1308_v18 }
  0x5d   :  { %1161 = vmatpush3.bf16.msra.mxu1 %v1349_v51 }
  0x5e   :  { %1162 = vmatprep.subr.bf16.mxu1 %v1350_v52 }
  0x5f   :  { %732 = vmatpush1.bf16.msra.mxu0 %v1306_v19 }
  0x60   :  { %733 = vmatprep.subr.bf16.mxu0 %v1311_v20 }
  0x61   :  { %1163 = vmatpush3.bf16.msra.mxu1 %v1351_v53 }
  0x62   :  { %1164 = vmatprep.subr.bf16.mxu1 %v1352_v54 }
  0x63   :  { %734 = vmatpush1.bf16.msra.mxu0 %v1309_v21 }
  0x64   :  { %735 = vmatprep.subr.bf16.mxu0 %v1314_v22 }
  0x65   :  { %1165 = vmatpush3.bf16.msra.mxu1 %v1353_v55 }
  0x66   :  { %1166 = vmatprep.subr.bf16.mxu1 %v1354_v56 }
  0x67   :  { %736 = vmatpush1.bf16.msra.mxu0 %v1312_v23 }
  0x68   :  { %737 = vmatprep.subr.bf16.mxu0 %v1317_v24 }
  0x69   :  { %1167 = vmatpush3.bf16.msra.mxu1 %v1355_v57 }
  0x6a   :  { %1168 = vmatprep.subr.bf16.mxu1 %v1356_v58 }
  0x6b   :  { %738 = vmatpush1.bf16.msra.mxu0 %v1315_v25  ;;  %v1358_v25 = vld [vmem:[%s1527_s5 + $0x18] sm:$0xff]  }
  0x6c   :  { %739 = vmatprep.subr.bf16.mxu0 %v1320_v26 }
  0x6d   :  { %1169 = vmatpush3.bf16.msra.mxu1 %v1357_v59 }
  0x6e   :  { %1181 = vmatprep.subr.bf16.mxu1 %v1387_v60 }
  0x6f   :  { %740 = vmatpush2.bf16.msra.mxu0 %v1318_v27  ;;  %v1359_v27 = vld [vmem:[%s1527_s5 + $0x10] sm:$0xff]  }
  0x70   :  { %741 = vmatprep.subr.bf16.mxu0 %v1323_v28  ;;  %v1360_v28 = vld [vmem:[%s1527_s5 + $0x8] sm:$0xff]  }
  0x73   :  { %742 = vmatpush2.bf16.msra.mxu0 %v1321_v29  ;;  %v1361_v29 = vld [vmem:[%s1527_s5] sm:$0xff]  }
  0x74   :  { %743 = vmatprep.subr.bf16.mxu0 %v1326_v30 }
  0x77   :  { %744 = vmatpush2.bf16.msra.mxu0 %v1324_v31  ;;  %v1131_v31 = vld [vmem:[%s1526_s4] ss:$0 sm:$0xff] }
  0x78   :  { %745 = vmatprep.subr.bf16.mxu0 %v1329_v32 }
  0x7b   :  { %746 = vmatpush2.bf16.msra.mxu0 %v1327_v33 }
  0x7c   :  { %747 = vmatprep.subr.bf16.mxu0 %v1332_v34 }
  0x7f   :  { %748 = vmatpush2.bf16.msra.mxu0 %v1330_v35 }
  0x80   :  { %749 = vmatprep.subr.bf16.mxu0 %v1335_v36 }
  0x83   :  { %750 = vmatpush2.bf16.msra.mxu0 %v1333_v37 }
  0x84   :  { %751 = vmatprep.subr.bf16.mxu0 %v1338_v38 }
  0x87   :  { %752 = vmatpush2.bf16.msra.mxu0 %v1336_v39  ;;  %v1148_v39 = vld [vmem:[%s1528_s6] ss:$0 sm:$0xff] }
  0x88   :  { %753 = vmatprep.subr.bf16.mxu0 %v1341_v40 }
  0x8b   :  { %754 = vmatpush2.bf16.msra.mxu0 %v1339_v41 }
  0x8e   :  { %756 = vmatmul.mubr.bf16.vlgmr.msra.gmra.mxu0 %v51_v43 }
 0x10e   :  { %v675_v61 = vpop.f32.mrf.mxu0 }
 0x10f   :  { %v716_v63 = vpop.f32.mrf.mxu1  ;;  %v676_v12 = vadd.f32 %v675_v61, %v154_v10 }
 0x110   :  { %v677_v62 = vpop.f32.mrf.mxu0 }
 0x111   :  { %v718_v1 = vpop.f32.mrf.mxu1  ;;  %v678_v13 = vadd.f32 %v677_v62, %v158_v11  ;;  %v717_v14 = vadd.f32 %v716_v63, %v676_v12 }
 0x112   :  { %v679_v0 = vpop.f32.mrf.mxu0 }
 0x113   :  { %v720_v3 = vpop.f32.mrf.mxu1  ;;  %v719_v16 = vadd.f32 %v718_v1, %v678_v13 }
 0x114   :  { %v680_v2 = vpop.f32.mrf.mxu0 }
 0x115   :  { %v721_v4 = vpop.f32.mrf.mxu1 }
 0x14e   :  { %v757_v15 = vpop.f32.mrf.mxu0 }
 0x14f   :  { %v758_v17 = vadd.f32 %v757_v15, %v717_v14 }
 0x150   :  { %v759_v18 = vpop.f32.mrf.mxu0 }
 0x151   :  { %v760_v19 = vadd.f32 %v759_v18, %v719_v16  ;;  %v764_v20 = vmax.f32 %v758_v17, 0.0 }
 0x152   :  { %v761_v21 = vpop.f32.mrf.mxu0 }
 0x153   :  { %v765_v22 = vmax.f32 %v760_v19, 0.0  ;;  %v766_v26 = vpack.c.bf16 %v764_v20, %v764_v20 }
 0x154   :  { %v762_v23 = vpop.f32.mrf.mxu0 }
 0x155   :  { %v767_v24 = vpack.c.bf16 %v765_v22, %v765_v22 }
 0x157   :  { %935 = vmatprep.mubr.bf16.mxu1 %v767_v24 }
 0x158   :  { %936 = vmatmul.mubr.bf16.vlgmr.msra.gmra.mxu1 %v766_v26 }
 0x159   :  { %1182 = vmatpush3.bf16.msra.mxu1 %v1358_v25  ;;  %1189 = vmatprep.mubr.msk.bf16.mxu1 %vm1388_vm0, %v1387_v60 }
 0x15a   :  { %1183 = vmatprep.subr.bf16.mxu1 %v1387_v60 }
 0x15d   :  { %1184 = vmatpush3.bf16.msra.mxu1 %v1359_v27 }
 0x15e   :  { %1185 = vmatprep.subr.bf16.mxu1 %v1387_v60 }
 0x161   :  { %1186 = vmatpush3.bf16.msra.mxu1 %v1360_v28 }
 0x162   :  { %1187 = vmatprep.subr.bf16.mxu1 %v1387_v60 }
 0x165   :  { %1188 = vmatpush3.bf16.msra.mxu1 %v1361_v29 }
 0x218   :  { %v1170_v30 = vpop.f32.mrf.mxu1 }
 0x21a   :  { %v1171_v32 = vpop.f32.mrf.mxu1 }
 0x21b   :  { %v1172_v33 = vadd.f32 %v1171_v32, %v1170_v30 }
 0x21c   :  { %v1173_v34 = vpop.f32.mrf.mxu1 }
 0x21d   :  { %v938_v35 = vadd.f32 %v1172_v33, %v1131_v31 }
 0x21e   :  { %v1174_v36 = vpop.f32.mrf.mxu1 }
 0x21f   :  { %v943_v37 = vmax.f32 %v938_v35, 0.0 }
 0x221   :  { %v944_v38 = vpack.c.bf16 %v943_v37, %v943_v37 }
 0x223   :  { %1190 = vmatmul.mubr.msk.bf16.vlgmr.msra.gmra.mxu1 %vm984_vm1, %v944_v38 }
 0x2e3   :  { %v1022_v40 = vpop.f32.mrf.mxu1 }
 0x2e4   :  { %v1023_v41 = vadd.f32 %v1148_v39, %v1022_v40 }
 0x2e5   :  { %v1191_v42 = vpop.f32.mrf.mxu1 }
 0x2e6   :  { %1029 = vst.msk [vmem:[%s1529_s7] sm:$0xff] %vm1028_vm2, %v1023_v41 }
 0x2e7   :  { %v1025_v43 = vpop.f32.mrf.mxu1 }
 0x2e9   :  { %v1192_v44 = vpop.f32.mrf.mxu1 }
 0x2ea   :  { %1034 = vsyncpa [#allocation3], 1 }

</bundles_post_ra>
